<compile_context>
chip_gen: v7x
topology: tpu7x:2x2x1
jax: 0.10.0
libtpu: 0.0.40
codegen_flags: <defaults>
</compile_context>

<pallas_src>
import functools

import jax
import jax.numpy as jnp
from jax.experimental import pallas as pl
from jax.experimental.pallas import tpu as pltpu


def _discriminator_kernel(x_ref, w1_ref, b1_ref, w2_ref, b2_ref, w3_ref, b3_ref,
                          o_ref, *, leaky_slope):
    """Fused MLP forward for one batch tile.

    x_ref:  (TM, I)  native dtype (cast to bf16 in-kernel)
    w1_ref: (I, H)   bf16        b1_ref: (1, H) f32
    w2_ref: (H, H)   bf16        b2_ref: (1, H) f32
    w3_ref: (H, O)   bf16        b3_ref: (1, O) f32
    o_ref:  (TM, O)  f32
    """
    x = x_ref[...].astype(w1_ref.dtype)

    # ---- layer 1: Linear + LeakyReLU (dropout is identity in eval) ----
    h1 = jnp.dot(x, w1_ref[...], preferred_element_type=jnp.float32) + b1_ref[...]
    h1 = jnp.where(h1 > 0, h1, leaky_slope * h1)

    # ---- layer 2: Linear + LeakyReLU ----
    h2 = jnp.dot(h1.astype(w2_ref.dtype), w2_ref[...],
                 preferred_element_type=jnp.float32) + b2_ref[...]
    h2 = jnp.where(h2 > 0, h2, leaky_slope * h2)

    # ---- layer 3: MXU-native (TM,H) x (H,O); w3 pre-transposed once outside ----
    logits = jnp.dot(h2.astype(w3_ref.dtype), w3_ref[...],
                     preferred_element_type=jnp.float32) + b3_ref[...]

    o_ref[...] = jax.nn.sigmoid(logits).astype(o_ref.dtype)


def prepare_params(params, compute_dtype=jnp.bfloat16):
    """Convert PyTorch-layout params ([out, in] weights) to kernel layout, once."""
    w1, b1, w2, b2, w3, b3 = params
    return (
        w1.T.astype(compute_dtype),            # (I, H)
        b1[None, :].astype(jnp.float32),       # (1, H)
        w2.T.astype(compute_dtype),            # (H, H)
        b2[None, :].astype(jnp.float32),       # (1, H)
        w3.T.astype(compute_dtype),            # (H, O)  -- transposed ONCE, MXU-native in-kernel
        b3[None, :].astype(jnp.float32),       # (1, O)
    )


def _choose_batch_tile(B, batch_tile):
    """Pick the batch tile: multiple of 128, and >=2 grid steps when B > 128 (v7x megacore)."""
    batch_tile = max(128, (int(batch_tile) // 128) * 128)   # clamp to a multiple of 128
    if B <= 128:
        return B                                            # single tile == full batch dim
    tm = min(batch_tile, max(128, 128 * ((B + 255) // 256)))  # aim for >= 2 grid steps
    if tm >= B:
        return B
    return tm


@functools.partial(jax.jit, static_argnames=("leaky_slope", "batch_tile"))
def discriminator_forward(x, kernel_params, leaky_slope, batch_tile=512):
    """x: [B, input_size] -> flat [B * output_size] f32 (matches torch's .view(-1))."""
    w1_t, b1_r, w2_t, b2_r, w3_t, b3_r = kernel_params
    B, I = x.shape
    H = w1_t.shape[1]
    O = w3_t.shape[1]

    tm = _choose_batch_tile(B, batch_tile)
    grid = (pl.cdiv(B, tm),)

    nbytes = lambda a: a.size * a.dtype.itemsize
    # VMEM budget: double-buffered x / out tiles, single-buffered weights, f32 intermediates.
    vmem_needed = (2 * tm * I * x.dtype.itemsize             # x tiles (2 buffers)
                   + sum(nbytes(a) for a in kernel_params)   # weights (Buffered(1))
                   + 2 * tm * max(O, 128) * 4                # out tiles (2 buffers, lane-padded)
                   + 3 * tm * H * 4)                         # h1/h2 f32 (+ bf16 casts)
    vmem_limit = int(min(max(2 * vmem_needed, 32 * 2**20), 64 * 2**20))

    cost = pl.CostEstimate(
        flops=2 * B * (I * H + H * H + H * O),
        transcendentals=B * O,                               # sigmoid exp
        bytes_accessed=int(nbytes(x) + sum(nbytes(a) for a in kernel_params) + B * O * 4),
    )

    kernel = functools.partial(_discriminator_kernel,
                               leaky_slope=float(leaky_slope))

    def resident(shape):
        # Constant block index every grid step -> single-buffered (saves a full
        # second VMEM copy of each resident weight).
        return pl.BlockSpec(shape, lambda i: (0, 0), pipeline_mode=pl.Buffered(1))

    out = pl.pallas_call(
        kernel,
        out_shape=jax.ShapeDtypeStruct((B, O), jnp.float32),
        grid_spec=pltpu.PrefetchScalarGridSpec(
            num_scalar_prefetch=0,
            grid=grid,
            in_specs=[
                pl.BlockSpec((tm, I), lambda i: (i, 0)),   # x tile (pipelined, native dtype)
                resident((I, H)),                          # w1
                resident((1, H)),                          # b1
                resident((H, H)),                          # w2
                resident((1, H)),                          # b2
                resident((H, O)),                          # w3 (pre-transposed)
                resident((1, O)),                          # b3
            ],
            out_specs=pl.BlockSpec((tm, O), lambda i: (i, 0)),
        ),
        compiler_params=pltpu.CompilerParams(
            dimension_semantics=("parallel",),
            vmem_limit_bytes=vmem_limit),
        cost_estimate=cost,
    )(x, w1_t, b1_r, w2_t, b2_r, w3_t, b3_r)

    # (B, O) row-major flatten == torch's .view(-1) on a (B, O) tensor; contiguous, free.
    return out.reshape(-1)


def init_params(key, input_size, hidden_size, output_size):
    """PyTorch-style Linear init: U(-1/sqrt(fan_in), 1/sqrt(fan_in)); deterministic."""
    def linear(k, fan_in, fan_out):
        kw, kb = jax.random.split(k)
        bound = 1.0 / jnp.sqrt(fan_in)
        w = jax.random.uniform(kw, (fan_out, fan_in), jnp.float32, -bound, bound)
        b = jax.random.uniform(kb, (fan_out,), jnp.float32, -bound, bound)
        return w, b

    k1, k2, k3 = jax.random.split(key, 3)
    w1, b1 = linear(k1, input_size, hidden_size)
    w2, b2 = linear(k2, hidden_size, hidden_size)
    w3, b3 = linear(k3, hidden_size, output_size)
    return (w1, b1, w2, b2, w3, b3)


def reference_forward(x, params, leaky_slope):
    """Pure-JAX reference mirroring the kernel's mixed precision (bf16 in, f32 acc)."""
    w1, b1, w2, b2, w3, b3 = params
    bf = jnp.bfloat16
    h = jnp.dot(x.astype(bf), w1.T.astype(bf),
                preferred_element_type=jnp.float32) + b1
    h = jnp.where(h > 0, h, leaky_slope * h)
    h = jnp.dot(h.astype(bf), w2.T.astype(bf),
                preferred_element_type=jnp.float32) + b2
    h = jnp.where(h > 0, h, leaky_slope * h)
    logits = jnp.dot(h.astype(bf), w3.T.astype(bf),
                     preferred_element_type=jnp.float32) + b3
    return jax.nn.sigmoid(logits).reshape(-1)


if __name__ == "__main__":
    leaky_slope = 0.2
    key = jax.random.PRNGKey(0)
    kx, kp, kp2 = jax.random.split(key, 3)

    # Config 1: input=16, hidden=32, output=1; small batch -> single tile.
    input_size, hidden_size, output_size = 16, 32, 1
    params = init_params(kp, input_size, hidden_size, output_size)
    kparams = prepare_params(params)

    batch = 8
    x = jax.random.normal(kx, (batch, input_size), dtype=jnp.float32)
    out = jax.block_until_ready(discriminator_forward(x, kparams, leaky_slope))
    ref = reference_forward(x, params, leaky_slope)
    assert out.shape == (batch * output_size,), out.shape
    assert jnp.allclose(out, ref, atol=1e-3, rtol=1e-3), (out, ref)

    # Config 2: multi-tile batch (grid=2, partial last tile, 'parallel' batch axis).
    batch2 = 1000
    x2 = jax.random.normal(jax.random.PRNGKey(1), (batch2, input_size), jnp.float32)
    out2 = jax.block_until_ready(discriminator_forward(x2, kparams, leaky_slope))
    ref2 = reference_forward(x2, params, leaky_slope)
    assert out2.shape == (batch2 * output_size,), out2.shape
    assert jnp.allclose(out2, ref2, atol=1e-3, rtol=1e-3)

    # Config 3: output_size > 1 exercises the general (B, O) -> .view(-1) flattening.
    params3 = init_params(kp2, input_size, hidden_size, 2)
    kparams3 = prepare_params(params3)
    batch3 = 50
    x3 = jax.random.normal(jax.random.PRNGKey(2), (batch3, input_size), jnp.float32)
    out3 = jax.block_until_ready(discriminator_forward(x3, kparams3, leaky_slope))
    ref3 = reference_forward(x3, params3, leaky_slope)
    assert out3.shape == (batch3 * 2,), out3.shape
    assert jnp.allclose(out3, ref3, atol=1e-3, rtol=1e-3)

    print("KERNEL_OK")
</pallas_src>

<mosaic_0001>
module attributes {stable_mosaic.version = 11 : i64} {
  func.func @_discriminator_kernel(%arg0: i32, %arg1: memref<8x16xf32, #tpu.memory_space<vmem>>, %arg2: memref<16x32xbf16, #tpu.memory_space<vmem>>, %arg3: memref<1x32xf32, #tpu.memory_space<vmem>>, %arg4: memref<32x32xbf16, #tpu.memory_space<vmem>>, %arg5: memref<1x32xf32, #tpu.memory_space<vmem>>, %arg6: memref<32x1xbf16, #tpu.memory_space<vmem>>, %arg7: memref<1x1xf32, #tpu.memory_space<vmem>>, %arg8: memref<8x1xf32, #tpu.memory_space<vmem>>) attributes {dimension_semantics = [#tpu.dimension_semantics<parallel>], iteration_bounds = array<i64: 1>, scalar_prefetch = 0 : i64, scratch_operands = 0 : i64, tpu.core_type = #tpu.core_type<tc>, window_params = [{transform_indices = @transform_0, window_bounds = array<i64: 8, 16>}, {pipeline_mode = #tpu.pipeline_mode<synchronous>, transform_indices = @transform_1, window_bounds = array<i64: 16, 32>}, {pipeline_mode = #tpu.pipeline_mode<synchronous>, transform_indices = @transform_2, window_bounds = array<i64: 1, 32>}, {pipeline_mode = #tpu.pipeline_mode<synchronous>, transform_indices = @transform_3, window_bounds = array<i64: 32, 32>}, {pipeline_mode = #tpu.pipeline_mode<synchronous>, transform_indices = @transform_4, window_bounds = array<i64: 1, 32>}, {pipeline_mode = #tpu.pipeline_mode<synchronous>, transform_indices = @transform_5, window_bounds = array<i64: 32, 1>}, {pipeline_mode = #tpu.pipeline_mode<synchronous>, transform_indices = @transform_6, window_bounds = array<i64: 1, 1>}, {transform_indices = @transform_7, window_bounds = array<i64: 8, 1>}]} {
    %c0 = arith.constant 0 : index
    %c0_0 = arith.constant 0 : index
    %0 = vector.load %arg1[%c0, %c0_0] : memref<8x16xf32, #tpu.memory_space<vmem>>, vector<8x16xf32>
    %1 = arith.truncf %0 : vector<8x16xf32> to vector<8x16xbf16>
    %c0_1 = arith.constant 0 : index
    %c0_2 = arith.constant 0 : index
    %2 = vector.load %arg2[%c0_1, %c0_2] : memref<16x32xbf16, #tpu.memory_space<vmem>>, vector<16x32xbf16>
    %cst = arith.constant dense<0.000000e+00> : vector<8x32xf32>
    %3 = tpu.matmul %1, %2, %cst {dimension_numbers = #tpu.dot_dimension_numbers<[1], [0], [0], [1], [0, 0, 1, 1], [], []>} : vector<8x16xbf16>, vector<16x32xbf16>, vector<8x32xf32> -> vector<8x32xf32>
    %c0_3 = arith.constant 0 : index
    %c0_4 = arith.constant 0 : index
    %4 = vector.load %arg3[%c0_3, %c0_4] : memref<1x32xf32, #tpu.memory_space<vmem>>, vector<1x32xf32>
    %5 = vector.broadcast %4 : vector<1x32xf32> to vector<8x32xf32>
    %6 = arith.addf %3, %5 : vector<8x32xf32>
    %cst_5 = arith.constant 0.000000e+00 : f32
    %7 = vector.broadcast %cst_5 : f32 to vector<8x32xf32>
    %8 = arith.cmpf ogt, %6, %7 : vector<8x32xf32>
    %cst_6 = arith.constant 2.000000e-01 : f32
    %9 = vector.broadcast %cst_6 : f32 to vector<8x32xf32>
    %10 = arith.mulf %9, %6 : vector<8x32xf32>
    %11 = arith.select %8, %6, %10 : vector<8x32xi1>, vector<8x32xf32>
    %12 = arith.truncf %11 : vector<8x32xf32> to vector<8x32xbf16>
    %c0_7 = arith.constant 0 : index
    %c0_8 = arith.constant 0 : index
    %13 = vector.load %arg4[%c0_7, %c0_8] : memref<32x32xbf16, #tpu.memory_space<vmem>>, vector<32x32xbf16>
    %cst_9 = arith.constant dense<0.000000e+00> : vector<8x32xf32>
    %14 = tpu.matmul %12, %13, %cst_9 {dimension_numbers = #tpu.dot_dimension_numbers<[1], [0], [0], [1], [0, 0, 1, 1], [], []>} : vector<8x32xbf16>, vector<32x32xbf16>, vector<8x32xf32> -> vector<8x32xf32>
    %c0_10 = arith.constant 0 : index
    %c0_11 = arith.constant 0 : index
    %15 = vector.load %arg5[%c0_10, %c0_11] : memref<1x32xf32, #tpu.memory_space<vmem>>, vector<1x32xf32>
    %16 = vector.broadcast %15 : vector<1x32xf32> to vector<8x32xf32>
    %17 = arith.addf %14, %16 : vector<8x32xf32>
    %cst_12 = arith.constant 0.000000e+00 : f32
    %18 = vector.broadcast %cst_12 : f32 to vector<8x32xf32>
    %19 = arith.cmpf ogt, %17, %18 : vector<8x32xf32>
    %cst_13 = arith.constant 2.000000e-01 : f32
    %20 = vector.broadcast %cst_13 : f32 to vector<8x32xf32>
    %21 = arith.mulf %20, %17 : vector<8x32xf32>
    %22 = arith.select %19, %17, %21 : vector<8x32xi1>, vector<8x32xf32>
    %23 = arith.truncf %22 : vector<8x32xf32> to vector<8x32xbf16>
    %c0_14 = arith.constant 0 : index
    %c0_15 = arith.constant 0 : index
    %24 = vector.load %arg6[%c0_14, %c0_15] : memref<32x1xbf16, #tpu.memory_space<vmem>>, vector<32x1xbf16>
    %cst_16 = arith.constant dense<0.000000e+00> : vector<8x1xf32>
    %25 = tpu.matmul %23, %24, %cst_16 {dimension_numbers = #tpu.dot_dimension_numbers<[1], [0], [0], [1], [0, 0, 1, 1], [], []>} : vector<8x32xbf16>, vector<32x1xbf16>, vector<8x1xf32> -> vector<8x1xf32>
    %c0_17 = arith.constant 0 : index
    %c0_18 = arith.constant 0 : index
    %26 = vector.load %arg7[%c0_17, %c0_18] : memref<1x1xf32, #tpu.memory_space<vmem>>, vector<1x1xf32>
    %27 = vector.broadcast %26 : vector<1x1xf32> to vector<8x1xf32>
    %28 = arith.addf %25, %27 : vector<8x1xf32>
    %29 = arith.negf %28 : vector<8x1xf32>
    %30 = math.exp %29 : vector<8x1xf32>
    %cst_19 = arith.constant 1.000000e+00 : f32
    %31 = vector.broadcast %cst_19 : f32 to vector<8x1xf32>
    %32 = arith.addf %31, %30 : vector<8x1xf32>
    %33 = arith.divf %31, %32 : vector<8x1xf32>
    %c0_20 = arith.constant 0 : index
    %c0_21 = arith.constant 0 : index
    %34 = vector.load %arg8[%c0_20, %c0_21] : memref<8x1xf32, #tpu.memory_space<vmem>>, vector<8x1xf32>
    tpu.vector_store %arg8[%c0_20, %c0_21], %33 {strides = array<i32>} : memref<8x1xf32, #tpu.memory_space<vmem>>, vector<8x1xf32>,
    return
  }
  func.func @transform_0(%arg0: i32) -> (i32, i32) {
    %c0_i32 = arith.constant 0 : i32
    %c0_i32_0 = arith.constant 0 : i32
    return %arg0, %c0_i32 : i32, i32
  }
  func.func @transform_1(%arg0: i32) -> (i32, i32) {
    %c0_i32 = arith.constant 0 : i32
    %c0_i32_0 = arith.constant 0 : i32
    %c0_i32_1 = arith.constant 0 : i32
    return %c0_i32, %c0_i32_0 : i32, i32
  }
  func.func @transform_2(%arg0: i32) -> (i32, i32) {
    %c0_i32 = arith.constant 0 : i32
    %c0_i32_0 = arith.constant 0 : i32
    %c0_i32_1 = arith.constant 0 : i32
    return %c0_i32, %c0_i32_0 : i32, i32
  }
  func.func @transform_3(%arg0: i32) -> (i32, i32) {
    %c0_i32 = arith.constant 0 : i32
    %c0_i32_0 = arith.constant 0 : i32
    %c0_i32_1 = arith.constant 0 : i32
    return %c0_i32, %c0_i32_0 : i32, i32
  }
  func.func @transform_4(%arg0: i32) -> (i32, i32) {
    %c0_i32 = arith.constant 0 : i32
    %c0_i32_0 = arith.constant 0 : i32
    %c0_i32_1 = arith.constant 0 : i32
    return %c0_i32, %c0_i32_0 : i32, i32
  }
  func.func @transform_5(%arg0: i32) -> (i32, i32) {
    %c0_i32 = arith.constant 0 : i32
    %c0_i32_0 = arith.constant 0 : i32
    %c0_i32_1 = arith.constant 0 : i32
    return %c0_i32, %c0_i32_0 : i32, i32
  }
  func.func @transform_6(%arg0: i32) -> (i32, i32) {
    %c0_i32 = arith.constant 0 : i32
    %c0_i32_0 = arith.constant 0 : i32
    %c0_i32_1 = arith.constant 0 : i32
    return %c0_i32, %c0_i32_0 : i32, i32
  }
  func.func @transform_7(%arg0: i32) -> (i32, i32) {
    %c0_i32 = arith.constant 0 : i32
    %c0_i32_0 = arith.constant 0 : i32
    return %arg0, %c0_i32 : i32, i32
  }
}

</mosaic_0001>

<bundles_post_ra>
// kernel: discriminator_forward.1
= control target key start
LH: loop header
LB: loop body
LE: loop exit
PB: predicated region body
PF: predicated region fallthrough
CT: control target
= control target key end

     0   :  { %s418_s0 = inlined_call_operand.vmem [shape: f32[8,16], index: 0, kind: input, shape index: {}]   ;;  %s419_s1 = inlined_call_operand.vmem [shape: bf16[16,32], index: 1, kind: input, shape index: {}]   ;;  %s420_s2 = inlined_call_operand.hbm [shape: f32[1,32], index: 2, kind: input, shape index: {}]   ;;  %s421_s3 = inlined_call_operand.vmem [shape: bf16[32,32], index: 3, kind: input, shape index: {}]   ;;  %s422_s4 = inlined_call_operand.vmem [shape: f32[1,32], index: 4, kind: input, shape index: {}]   ;;  %s423_s5 = inlined_call_operand.vmem [shape: bf16[32,1], index: 5, kind: input, shape index: {}]   ;;  %s424_s6 = inlined_call_operand.<no memory space> [shape: f32[1,1], index: 6, kind: input, shape index: {}]   ;;  %s425_s7 = inlined_call_operand.vmem [shape: f32[8,1], index: 7, kind: output, shape index: {}]  }
   0x1   :  { %v12_v0 = vstv %s424_s6 }
   0x2   :  { %13 = vst [vmem:[#allocation2] sm:$0x1] %v12_v0 }
   0x3   :  { %14 = vsyncpa [#allocation4], 0  ;;  %s334_s26 = smov [#allocation3]   ;;  %s310_s30 = scalar_lea.hbm %s420_s2, 16 }
   0x4   :  { %s25_s27 = sshll.u32 %s334_s26, 4  ;;  %p311_p0 = scmp.ne.s32.totalorder %s420_s2, %s310_s30  ;;  %s26_s27 = int_to_ptr.vmem [resolvable:$true] %s25_s27 }
   0x5   :  { %p314_p1 = scmp.lt.u32.totalorder %s310_s30, %s420_s2 }
   0x7   :  { %p316_p2 = pnand %p314_p1, %p311_p0 }
   0x9   :  { %319 = shalt.err (!%p316_p2)
}
   0xa   :  { %s320_s6 = scalar_lea.vmem %s26_s27, 16  ;;  %s324_s12 = scalar_lea.vmem %s26_s27, 32 }
   0xb   :  { %p321_p3 = scmp.ne.s32.totalorder %s26_s27, %s320_s6  ;;  %p325_p4 = scmp.lt.s32.totalorder %s26_s27, %s26_s27 }
   0xc   :  { %p326_p5 = scmp.lt.s32.totalorder %s324_s12, %s320_s6 }
   0xe   :  { %p327_p6 = por %p326_p5, %p325_p4 }
  0x10   :  { %p328_p7 = pnand %p327_p6, %p321_p3 }
  0x12   :  { %331 = shalt.err (!%p328_p7)
}
  0x13   :  { %28 = dma.hbm_to_vmem [thread:$0]  %s420_s2, 16, %s26_s27, [#allocation4]  }
  0x14   :  { %332 = dma.done.wait [#allocation4], 16  }
  0x15   :  { %333 = vsyncadd [#allocation4], 4294967280  ;;  %v335_v1 = vmov 0.0   ;;  %vm336_vm0 = vmmov 0   ;;  %v301_v2 = vld [vmem:[%s419_s1] sm:$0xff]   ;;  %vm58_vm1 = vcmask 130048  }
  0x16   :  { %276 = vmatprep.subr.bf16.mxu0 %v335_v1  ;;  %278 = vmatprep.mubr.msk.bf16.mxu0 %vm336_vm0, %v335_v1  ;;  %v41_v3 = vld [vmem:[%s418_s0] sm:$0xff]  ;;  %v303_v6 = vld [vmem:[%s421_s3 + $0x8] sm:$0xff]   ;;  %vm129_vm3 = vcmask 261120   ;;  %vm249_vm5 = vcmask 7168  }
  0x17   :  { %282 = vmatprep.subr.bf16.mxu1 %v335_v1  ;;  %286 = vmatprep.mubr.msk.bf16.mxu1 %vm336_vm0, %v335_v1  ;;  %v42_v4 = vpack.c.bf16 %v41_v3, %v41_v3  ;;  %v302_v5 = vld [vmem:[%s421_s3] sm:$0xff]   ;;  %v305_v17 = vld [vmem:[%s423_s5 + $0x8] sm:$0xff]  }
  0x18   :  { %277 = vmatpush3.bf16.msra.mxu0 %v301_v2  ;;  %283 = vmatpush3.bf16.msra.mxu1 %v302_v5  ;;  %v256_v7 = vld [vmem:[#allocation3] ss:$0 sm:$0xff]  ;;  %v259_v18 = vld [vmem:[%s422_s4] ss:$0 sm:$0xff] }
  0x19   :  { %290 = vmatprep.subr.bf16.mxu0 %v335_v1  ;;  %284 = vmatprep.subr.bf16.mxu1 %v335_v1  ;;  %v304_v16 = vld [vmem:[%s423_s5] sm:$0xff]  }
  0x1a   :  { %v263_v27 = vld [vmem:[#allocation2] ss:$0 sm:$0xff] }
  0x1b   :  { %279 = vmatmul.mubr.msk.bf16.vlgmr.msra.gmra.mrb[0].mxu0 %vm58_vm1, %v42_v4 }
  0x1c   :  { %294 = vmatprep.mubr.msk.bf16.mxu0 %vm336_vm0, %v335_v1  ;;  %285 = vmatpush3.bf16.msra.mxu1 %v303_v6 }
  0x1d   :  { %291 = vmatpush3.bf16.msra.mxu0 %v304_v16 }
  0x1e   :  { %292 = vmatprep.subr.bf16.mxu0 %v335_v1 }
  0x21   :  { %293 = vmatpush3.bf16.msra.mxu0 %v305_v17 }
  0xee   :  { %v96_v8 = vpop.f32.mrb[0].mxu0 }
  0xef   :  { %v97_v9 = vadd.f32 %v256_v7, %v96_v8  ;;  %v280_v10 = vpop.f32.mrb[1].mxu0 }
  0xf0   :  { %v99_v11 = vpop.f32.mrb[2].mxu0 }
  0xf1   :  { %vm102_vm2 = vcmp.gt.f32.partialorder %v97_v9, 0.0  ;;  %v103_v12 = vmul.f32 0.2, %v97_v9  ;;  %v281_v13 = vpop.f32.mrb[3].mxu0 }
  0xf3   :  { %v104_v14 = vsel %vm102_vm2, %v97_v9, %v103_v12 }
  0xf4   :  { %v105_v15 = vpack.c.bf16 %v104_v14, %v104_v14 }
  0xf6   :  { %287 = vmatmul.mubr.msk.bf16.vlgmr.msra.gmra.mrb[0].mxu1 %vm129_vm3, %v105_v15 }
 0x1c9   :  { %v167_v19 = vpop.f32.mrb[0].mxu1 }
 0x1ca   :  { %v168_v20 = vadd.f32 %v259_v18, %v167_v19  ;;  %v288_v21 = vpop.f32.mrb[1].mxu1 }
 0x1cb   :  { %v170_v22 = vpop.f32.mrb[2].mxu1 }
 0x1cc   :  { %vm173_vm4 = vcmp.gt.f32.partialorder %v168_v20, 0.0  ;;  %v174_v23 = vmul.f32 0.2, %v168_v20  ;;  %v289_v24 = vpop.f32.mrb[3].mxu1 }
 0x1ce   :  { %v175_v25 = vsel %vm173_vm4, %v168_v20, %v174_v23 }
 0x1cf   :  { %v176_v26 = vpack.c.bf16 %v175_v25, %v175_v25 }
 0x1d1   :  { %295 = vmatmul.mubr.msk.bf16.vlgmr.msra.gmra.mrb[4].mxu0 %vm129_vm3, %v176_v26 }
 0x2a4   :  { %v237_v28 = vpop.f32.mrb[4].mxu0 }
 0x2a5   :  { %v238_v29 = vadd.f32 %v263_v27, %v237_v28  ;;  %v296_v30 = vpop.f32.mrb[5].mxu0 }
 0x2a6   :  { %v240_v31 = vpop.f32.mrb[6].mxu0 }
 0x2a7   :  { %v267_v32 = vmul.f32 -1.442695, %v238_v29  ;;  %v297_v33 = vpop.f32.mrb[7].mxu0 }
 0x2a9   :  { %306 = vpow2.f32 %v267_v32 }
 0x2b3   :  { %v307_v34 = vpop.eup %306 }
 0x2b4   :  { %v246_v35 = vadd.f32 1.0, %v307_v34 }
 0x2b6   :  { %308 = vrcp.f32 %v246_v35 }
 0x2c0   :  { %v309_v36 = vpop.eup %308 }
 0x2c1   :  { %250 = vst.msk [vmem:[%s425_s7] sm:$0xff] %vm249_vm5, %v309_v36 }
 0x2c2   :  { %255 = vsyncpa [#allocation4], 1 }

</bundles_post_ra>
